<compile_context>
chip_gen: v7x
topology: tpu7x:2x2x1
jax: 0.10.0
libtpu: 0.0.40
codegen_flags: <defaults>
</compile_context>

<pallas_src>
import functools
import math

import jax
import jax.numpy as jnp
from jax import lax
from jax.experimental import pallas as pl
from jax.experimental.pallas import tpu as pltpu


def _round_up(a: int, b: int) -> int:
    return ((a + b - 1) // b) * b


def ffn_kernel(x_ref, w1_ref, b1_ref, w2_ref, b2_ref, o_ref, acc_ref, *,
               inner_chunk: int, n_inner: int, mxu_dtype):
    """One (row-tile i, d_ff-chunk k) grid step of y = relu(x@w1+b1)@w2 + b2."""
    k = pl.program_id(1)

    @pl.when(k == 0)
    def _init():
        acc_ref[...] = jnp.zeros_like(acc_ref)

    x = x_ref[...]
    if mxu_dtype is not None:
        x = x.astype(mxu_dtype)

    def chunk_contrib(j, acc):
        off = j * inner_chunk
        if not isinstance(j, int):
            off = pl.multiple_of(off, inner_chunk)
        w1c = w1_ref[:, pl.ds(off, inner_chunk)]
        b1c = b1_ref[:, pl.ds(off, inner_chunk)]
        w2c = w2_ref[pl.ds(off, inner_chunk), :]
        if mxu_dtype is not None:
            w1c = w1c.astype(mxu_dtype)
            w2c = w2c.astype(mxu_dtype)
        h = jnp.dot(x, w1c, preferred_element_type=jnp.float32)   # MXU, f32 acc
        h = h + b1c.astype(jnp.float32)                           # bias (VPU, f32)
        h = jnp.maximum(h, 0.0)                                    # ReLU (VPU, f32)
        h = h.astype(w2c.dtype)                                    # downcast only at MXU input
        return acc + jnp.dot(h, w2c, preferred_element_type=jnp.float32)

    if n_inner == 1:
        acc_ref[...] = chunk_contrib(0, acc_ref[...])
    else:
        acc_ref[...] = lax.fori_loop(0, n_inner, chunk_contrib, acc_ref[...],
                                     unroll=(n_inner <= 8))

    @pl.when(k == pl.num_programs(1) - 1)
    def _finalize():
        o_ref[...] = (acc_ref[...] + b2_ref[...].astype(jnp.float32)).astype(o_ref.dtype)


@functools.partial(jax.jit, static_argnames=("tm", "vmem_limit_bytes", "mxu_dtype"))
def positionwise_ffn(x, w1, b1, w2, b2, *, tm=256,
                     vmem_limit_bytes=48 * 1024 * 1024, mxu_dtype=None):
    """y = relu(x @ w1 + b1) @ w2 + b2 for x: (batch, seq, d_model).

    tm: row tile (tokens per grid step). 256 default; 512 pays off on v6e/v7x when the
        VMEM budget allows, 128-256 on v5e.
    vmem_limit_bytes: scoped VMEM budget for Mosaic. 48 MiB is safe on v7x (64 MiB
        physical per TC); can be raised toward ~100 MiB on v5e/v6e.
    mxu_dtype: optional dtype (e.g. jnp.bfloat16) the matmul inputs are cast to;
        accumulation stays f32. Large MXU-throughput win for f32 data (esp. v5e).
    """
    batch, seq, d_model = x.shape
    d_ff = w1.shape[1]
    n = batch * seq
    x2 = x.reshape(n, d_model)

    # ---- row tiling -------------------------------------------------------
    tm_eff = max(8, min(_round_up(tm, 8), _round_up(n, 8)))
    n_pad = pl.cdiv(n, tm_eff) * tm_eff
    if n_pad != n:
        # TODO(synk): in mem-bound regimes handle the ragged tail in-kernel (masked
        # store on the last row tile) instead of paying the pad + slice HBM copies.
        x2 = jnp.pad(x2, ((0, n_pad - n), (0, 0)))
    num_row_tiles = n_pad // tm_eff

    x_isz = jnp.dtype(x.dtype).itemsize
    w_isz = jnp.dtype(w1.dtype).itemsize
    b_isz = jnp.dtype(b1.dtype).itemsize

    # ---- d_ff tiling: resident weights if they fit, streamed chunks otherwise ----
    usable = int(vmem_limit_bytes * 0.75)        # headroom for Mosaic internal scratch

    def inner_of(tk):
        return math.gcd(tk, 512) if tk % 128 == 0 else tk

    def footprint(tk, nbuf_w):
        fp = 2 * tm_eff * d_model * x_isz                 # x tiles (double-buffered)
        fp += 2 * tm_eff * d_model * x_isz                # out tiles (double-buffered)
        fp += nbuf_w * (2 * d_model * tk) * w_isz         # w1 + w2 chunk(s)
        fp += nbuf_w * tk * b_isz                         # b1 chunk(s)
        fp += d_model * b_isz                             # b2 (single-buffered)
        fp += tm_eff * d_model * 4                        # f32 accumulator scratch
        fp += 2 * tm_eff * inner_of(tk) * 4               # live hidden chunk (+ cast copy)
        return fp

    if footprint(d_ff, nbuf_w=1) <= usable:
        tk = d_ff                                         # weights fully VMEM-resident
    else:
        tk = None
        for cand in (4096, 2048, 1024, 512, 256, 128):
            if cand < d_ff and d_ff % cand == 0 and footprint(cand, nbuf_w=2) <= usable:
                tk = cand
                break
        if tk is None:
            tk = 128 if (d_ff % 128 == 0 and d_ff > 128) else d_ff

    k_tiles = d_ff // tk
    weights_resident = (k_tiles == 1)
    inner_chunk = inner_of(tk)
    n_inner = tk // inner_chunk

    # Constant-index operands have no "next" block to prefetch -> single buffer.
    def const_or_stream_spec(shape, index_map):
        if weights_resident:
            return pl.BlockSpec(shape, index_map, pipeline_mode=pl.Buffered(1))
        return pl.BlockSpec(shape, index_map)   # streamed: keep default double-buffering

    kernel = functools.partial(ffn_kernel, inner_chunk=inner_chunk,
                               n_inner=n_inner, mxu_dtype=mxu_dtype)

    w_reads = 1 if weights_resident else num_row_tiles    # weights re-read per row tile
    cost = pl.CostEstimate(
        flops=2 * 2 * n_pad * d_model * d_ff,             # two matmuls
        transcendentals=0,
        bytes_accessed=(2 * n_pad * d_model * x_isz       # x in + y out
                        + w_reads * 2 * d_model * d_ff * w_isz
                        + w_reads * d_ff * b_isz + d_model * b_isz),
    )

    out2 = pl.pallas_call(
        kernel,
        out_shape=jax.ShapeDtypeStruct((n_pad, d_model), x.dtype),
        grid_spec=pltpu.PrefetchScalarGridSpec(
            num_scalar_prefetch=0,
            grid=(num_row_tiles, k_tiles),                # reduction (d_ff) axis last
            in_specs=[
                pl.BlockSpec((tm_eff, d_model), lambda i, k: (i, 0)),      # x tile
                const_or_stream_spec((d_model, tk), lambda i, k: (0, k)),  # w1
                const_or_stream_spec((1, tk), lambda i, k: (0, k)),        # b1
                const_or_stream_spec((tk, d_model), lambda i, k: (k, 0)),  # w2
                pl.BlockSpec((1, d_model), lambda i, k: (0, 0),
                             pipeline_mode=pl.Buffered(1)),                # b2
            ],
            out_specs=pl.BlockSpec((tm_eff, d_model), lambda i, k: (i, 0)),
            scratch_shapes=[pltpu.VMEM((tm_eff, d_model), jnp.float32)],
        ),
        compiler_params=pltpu.CompilerParams(
            dimension_semantics=("parallel", "arbitrary"),  # row tiles shard across TCs
            vmem_limit_bytes=vmem_limit_bytes,
        ),
        cost_estimate=cost,
    )(x2, w1, b1, w2, b2)

    if n_pad != n:
        out2 = out2[:n]
    return out2.reshape(batch, seq, d_model)


if __name__ == "__main__":
    # Small, MXU/VPU-friendly sizes consistent with the module's shapes.
    batch, seq, d_model, d_ff = 2, 8, 128, 256

    key = jax.random.PRNGKey(0)
    kx, kw1, kb1, kw2, kb2 = jax.random.split(key, 5)

    # PyTorch Linear weights (out, in) stored pre-transposed for the kernel.
    x = jax.random.normal(kx, (batch, seq, d_model), dtype=jnp.float32)
    w1 = jax.random.normal(kw1, (d_model, d_ff), dtype=jnp.float32) * 0.05
    b1 = jax.random.normal(kb1, (1, d_ff), dtype=jnp.float32) * 0.05
    w2 = jax.random.normal(kw2, (d_ff, d_model), dtype=jnp.float32) * 0.05
    b2 = jax.random.normal(kb2, (1, d_model), dtype=jnp.float32) * 0.05

    ref = jnp.maximum(x @ w1 + b1[0], 0.0) @ w2 + b2[0]

    # 1) f32 datapath (matches PyTorch module numerics).
    out = jax.block_until_ready(positionwise_ffn(x, w1, b1, w2, b2))
    assert out.shape == (batch, seq, d_model)
    assert jnp.allclose(out, ref, atol=1e-4, rtol=1e-4)

    # 2) f32 data with bf16 MXU inputs (f32 accumulation) — the v5e-recommended path.
    out_mxu = jax.block_until_ready(
        positionwise_ffn(x, w1, b1, w2, b2, mxu_dtype=jnp.bfloat16))
    assert jnp.allclose(out_mxu, ref, atol=5e-2, rtol=5e-2)

    # 3) bf16 weights/activations (hidden downcast right before the second matmul).
    xb, w1b, b1b, w2b, b2b = (a.astype(jnp.bfloat16) for a in (x, w1, b1, w2, b2))
    out_b = jax.block_until_ready(positionwise_ffn(xb, w1b, b1b, w2b, b2b))
    hb = jnp.maximum(xb.astype(jnp.float32) @ w1b.astype(jnp.float32)
                     + b1b[0].astype(jnp.float32), 0.0)
    hb = hb.astype(jnp.bfloat16).astype(jnp.float32)
    ref_b = hb @ w2b.astype(jnp.float32) + b2b[0].astype(jnp.float32)
    assert out_b.shape == (batch, seq, d_model)
    assert jnp.allclose(out_b.astype(jnp.float32), ref_b, atol=5e-2, rtol=5e-2)

    print("KERNEL_OK")
</pallas_src>

<mosaic_0001>
module attributes {stable_mosaic.version = 11 : i64} {
  func.func @ffn_kernel(%arg0: i32, %arg1: i32, %arg2: memref<16x128xf32, #tpu.memory_space<vmem>>, %arg3: memref<128x256xf32, #tpu.memory_space<vmem>>, %arg4: memref<1x256xf32, #tpu.memory_space<vmem>>, %arg5: memref<256x128xf32, #tpu.memory_space<vmem>>, %arg6: memref<1x128xf32, #tpu.memory_space<vmem>>, %arg7: memref<16x128xf32, #tpu.memory_space<vmem>>, %arg8: memref<16x128xf32, #tpu.memory_space<vmem>>) attributes {dimension_semantics = [#tpu.dimension_semantics<parallel>, #tpu.dimension_semantics<arbitrary>], iteration_bounds = array<i64: 1, 1>, scalar_prefetch = 0 : i64, scratch_operands = 1 : i64, tpu.core_type = #tpu.core_type<tc>, window_params = [{transform_indices = @transform_0, window_bounds = array<i64: 16, 128>}, {pipeline_mode = #tpu.pipeline_mode<synchronous>, transform_indices = @transform_1, window_bounds = array<i64: 128, 256>}, {pipeline_mode = #tpu.pipeline_mode<synchronous>, transform_indices = @transform_2, window_bounds = array<i64: 1, 256>}, {pipeline_mode = #tpu.pipeline_mode<synchronous>, transform_indices = @transform_3, window_bounds = array<i64: 256, 128>}, {pipeline_mode = #tpu.pipeline_mode<synchronous>, transform_indices = @transform_4, window_bounds = array<i64: 1, 128>}, {transform_indices = @transform_5, window_bounds = array<i64: 16, 128>}]} {
    %c0_i32 = arith.constant 0 : i32
    %0 = arith.cmpi eq, %arg1, %c0_i32 : i32
    %1 = arith.extui %0 : i1 to i32
    %c0_i32_0 = arith.constant 0 : i32
    %2 = arith.cmpi ne, %1, %c0_i32_0 : i32
    scf.if %2 {
      %cst_16 = arith.constant 0.000000e+00 : f32
      %19 = vector.broadcast %cst_16 : f32 to vector<16x128xf32>
      %c0_17 = arith.constant 0 : index
      %c0_18 = arith.constant 0 : index
      %20 = vector.load %arg8[%c0_17, %c0_18] : memref<16x128xf32, #tpu.memory_space<vmem>>, vector<16x128xf32>
      tpu.vector_store %arg8[%c0_17, %c0_18], %19 {strides = array<i32>} : memref<16x128xf32, #tpu.memory_space<vmem>>, vector<16x128xf32>,
    } else {
    }
    %c0 = arith.constant 0 : index
    %c0_1 = arith.constant 0 : index
    %3 = vector.load %arg2[%c0, %c0_1] : memref<16x128xf32, #tpu.memory_space<vmem>>, vector<16x128xf32>
    %c0_2 = arith.constant 0 : index
    %c0_3 = arith.constant 0 : index
    %4 = vector.load %arg8[%c0_2, %c0_3] : memref<16x128xf32, #tpu.memory_space<vmem>>, vector<16x128xf32>
    %c0_4 = arith.constant 0 : index
    %c0_5 = arith.constant 0 : index
    %5 = vector.load %arg3[%c0_4, %c0_5] : memref<128x256xf32, #tpu.memory_space<vmem>>, vector<128x256xf32>
    %c0_6 = arith.constant 0 : index
    %c0_7 = arith.constant 0 : index
    %6 = vector.load %arg4[%c0_6, %c0_7] : memref<1x256xf32, #tpu.memory_space<vmem>>, vector<1x256xf32>
    %c0_8 = arith.constant 0 : index
    %c0_9 = arith.constant 0 : index
    %7 = vector.load %arg5[%c0_8, %c0_9] : memref<256x128xf32, #tpu.memory_space<vmem>>, vector<256x128xf32>
    %cst = arith.constant dense<0.000000e+00> : vector<16x256xf32>
    %8 = tpu.matmul %3, %5, %cst {dimension_numbers = #tpu.dot_dimension_numbers<[1], [0], [0], [1], [0, 0, 1, 1], [], []>} : vector<16x128xf32>, vector<128x256xf32>, vector<16x256xf32> -> vector<16x256xf32>
    %9 = vector.broadcast %6 : vector<1x256xf32> to vector<16x256xf32>
    %10 = arith.addf %8, %9 : vector<16x256xf32>
    %cst_10 = arith.constant 0.000000e+00 : f32
    %11 = vector.broadcast %cst_10 : f32 to vector<16x256xf32>
    %12 = arith.maximumf %10, %11 : vector<16x256xf32>
    %cst_11 = arith.constant dense<0.000000e+00> : vector<16x128xf32>
    %13 = tpu.matmul %12, %7, %cst_11 {dimension_numbers = #tpu.dot_dimension_numbers<[1], [0], [0], [1], [0, 0, 1, 1], [], []>} : vector<16x256xf32>, vector<256x128xf32>, vector<16x128xf32> -> vector<16x128xf32>
    %14 = arith.addf %4, %13 : vector<16x128xf32>
    %c0_12 = arith.constant 0 : index
    %c0_13 = arith.constant 0 : index
    %15 = vector.load %arg8[%c0_12, %c0_13] : memref<16x128xf32, #tpu.memory_space<vmem>>, vector<16x128xf32>
    tpu.vector_store %arg8[%c0_12, %c0_13], %14 {strides = array<i32>} : memref<16x128xf32, #tpu.memory_space<vmem>>, vector<16x128xf32>,
    %c0_i32_14 = arith.constant 0 : i32
    %16 = arith.cmpi eq, %arg1, %c0_i32_14 : i32
    %17 = arith.extui %16 : i1 to i32
    %c0_i32_15 = arith.constant 0 : i32
    %18 = arith.cmpi ne, %17, %c0_i32_15 : i32
    scf.if %18 {
      %c0_16 = arith.constant 0 : index
      %c0_17 = arith.constant 0 : index
      %19 = vector.load %arg8[%c0_16, %c0_17] : memref<16x128xf32, #tpu.memory_space<vmem>>, vector<16x128xf32>
      %c0_18 = arith.constant 0 : index
      %c0_19 = arith.constant 0 : index
      %20 = vector.load %arg6[%c0_18, %c0_19] : memref<1x128xf32, #tpu.memory_space<vmem>>, vector<1x128xf32>
      %21 = vector.broadcast %20 : vector<1x128xf32> to vector<16x128xf32>
      %22 = arith.addf %19, %21 : vector<16x128xf32>
      %c0_20 = arith.constant 0 : index
      %c0_21 = arith.constant 0 : index
      %23 = vector.load %arg7[%c0_20, %c0_21] : memref<16x128xf32, #tpu.memory_space<vmem>>, vector<16x128xf32>
      tpu.vector_store %arg7[%c0_20, %c0_21], %22 {strides = array<i32>} : memref<16x128xf32, #tpu.memory_space<vmem>>, vector<16x128xf32>,
    } else {
    }
    return
  }
  func.func @transform_0(%arg0: i32, %arg1: i32) -> (i32, i32) {
    %c0_i32 = arith.constant 0 : i32
    %c0_i32_0 = arith.constant 0 : i32
    return %arg0, %c0_i32 : i32, i32
  }
  func.func @transform_1(%arg0: i32, %arg1: i32) -> (i32, i32) {
    %c0_i32 = arith.constant 0 : i32
    %c0_i32_0 = arith.constant 0 : i32
    return %c0_i32, %arg1 : i32, i32
  }
  func.func @transform_2(%arg0: i32, %arg1: i32) -> (i32, i32) {
    %c0_i32 = arith.constant 0 : i32
    %c0_i32_0 = arith.constant 0 : i32
    return %c0_i32, %arg1 : i32, i32
  }
  func.func @transform_3(%arg0: i32, %arg1: i32) -> (i32, i32) {
    %c0_i32 = arith.constant 0 : i32
    %c0_i32_0 = arith.constant 0 : i32
    return %arg1, %c0_i32 : i32, i32
  }
  func.func @transform_4(%arg0: i32, %arg1: i32) -> (i32, i32) {
    %c0_i32 = arith.constant 0 : i32
    %c0_i32_0 = arith.constant 0 : i32
    %c0_i32_1 = arith.constant 0 : i32
    return %c0_i32, %c0_i32_0 : i32, i32
  }
  func.func @transform_5(%arg0: i32, %arg1: i32) -> (i32, i32) {
    %c0_i32 = arith.constant 0 : i32
    %c0_i32_0 = arith.constant 0 : i32
    return %arg0, %c0_i32 : i32, i32
  }
}

</mosaic_0001>

<bundles_post_ra>
// kernel: positionwise_ffn.1
= control target key start
LH: loop header
LB: loop body
LE: loop exit
PB: predicated region body
PF: predicated region fallthrough
CT: control target
= control target key end

     0   :  { %10 = vsyncpa [#allocation4], 0  ;;  %s652_s0 = inlined_call_operand.hbm [shape: f32[16,128], index: 0, kind: input, shape index: {}]   ;;  %s653_s1 = inlined_call_operand.hbm [shape: f32[128,256], index: 1, kind: input, shape index: {}]   ;;  %s654_s2 = inlined_call_operand.vmem [shape: f32[1,256], index: 2, kind: input, shape index: {}]   ;;  %s655_s3 = inlined_call_operand.hbm [shape: f32[256,128], index: 3, kind: input, shape index: {}]   ;;  %s656_s4 = inlined_call_operand.vmem [shape: f32[1,128], index: 4, kind: input, shape index: {}]   ;;  %s657_s5 = inlined_call_operand.hbm [shape: f32[16,128], index: 5, kind: output, shape index: {}]  }
   0x1   :  { %11 = vsyncpa [#allocation7], 0 }
   0x2   :  { %12 = vsyncpa [#allocation5], 0  ;;  %s548_s18 = smov [#allocation6]   ;;  %s454_s22 = scalar_lea.hbm %s653_s1, 4096 }
   0x3   :  { %s30_s19 = sshll.u32 %s548_s18, 4  ;;  %p455_p0 = scmp.ne.s32.totalorder %s653_s1, %s454_s22  ;;  %s31_s19 = int_to_ptr.vmem [resolvable:$true] %s30_s19 }
   0x4   :  { %p458_p1 = scmp.lt.u32.totalorder %s454_s22, %s653_s1 }
   0x6   :  { %p460_p2 = pnand %p458_p1, %p455_p0 }
   0x8   :  { %463 = shalt.err (!%p460_p2)
}
   0x9   :  { %s464_s27 = scalar_lea.vmem %s31_s19, 4096  ;;  %p469_p4 = scmp.lt.s32.totalorder %s31_s19, %s31_s19 }
   0xa   :  { %p465_p3 = scmp.ne.s32.totalorder %s31_s19, %s464_s27  ;;  %p470_p5 = scmp.lt.s32.totalorder %s464_s27, %s464_s27 }
   0xc   :  { %p471_p6 = por %p470_p5, %p469_p4 }
   0xe   :  { %p472_p7 = pnand %p471_p6, %p465_p3 }
  0x10   :  { %475 = shalt.err (!%p472_p7)
}
  0x11   :  { %s549_s28 = smov 256   ;;  %s550_s29 = smov 16  }
  0x12   :  { %36 = dma.hbm_to_vmem [thread:$0]  %s653_s1, 4096, %s31_s19, [#allocation7], %s549_s28, %s549_s28, %s550_s29  }
  0x13   :  { %s551_s7 = smov [#allocation3]   ;;  %s476_s11 = scalar_lea.hbm %s652_s0, 256 }
  0x14   :  { %s18_s8 = sshll.u32 %s551_s7, 4  ;;  %p477_p8 = scmp.ne.s32.totalorder %s652_s0, %s476_s11  ;;  %s19_s8 = int_to_ptr.vmem [resolvable:$true] %s18_s8 }
  0x15   :  { %p480_p9 = scmp.lt.u32.totalorder %s476_s11, %s652_s0 }
  0x17   :  { %p482_p10 = pnand %p480_p9, %p477_p8 }
  0x19   :  { %485 = shalt.err (!%p482_p10)
}
  0x1a   :  { %s486_s16 = scalar_lea.vmem %s19_s8, 256  ;;  %p491_p12 = scmp.lt.s32.totalorder %s19_s8, %s19_s8 }
  0x1b   :  { %p487_p11 = scmp.ne.s32.totalorder %s19_s8, %s486_s16  ;;  %p492_p13 = scmp.lt.s32.totalorder %s486_s16, %s486_s16 }
  0x1d   :  { %p493_p0 = por %p492_p13, %p491_p12 }
  0x1f   :  { %p494_p1 = pnand %p493_p0, %p487_p11 }
  0x21   :  { %497 = shalt.err (!%p494_p1)
}
  0x22   :  { %s552_s1 = smov 128   ;;  %s553_s17 = smov 8  }
  0x23   :  { %24 = dma.hbm_to_vmem [thread:$0]  %s652_s0, 256, %s19_s8, [#allocation4], %s552_s1, %s552_s1, %s553_s17  }
  0x24   :  { %s554_s20 = smov [#allocation8]   ;;  %s498_s24 = scalar_lea.hbm %s655_s3, 4096 }
  0x25   :  { %s44_s21 = sshll.u32 %s554_s20, 4  ;;  %p499_p2 = scmp.ne.s32.totalorder %s655_s3, %s498_s24  ;;  %s45_s21 = int_to_ptr.vmem [resolvable:$true] %s44_s21 }
  0x26   :  { %p502_p3 = scmp.lt.u32.totalorder %s498_s24, %s655_s3 }
  0x28   :  { %p504_p4 = pnand %p502_p3, %p499_p2 }
  0x2a   :  { %507 = shalt.err (!%p504_p4)
}
  0x2b   :  { %s508_s29 = scalar_lea.vmem %s45_s21, 4096  ;;  %p513_p6 = scmp.lt.s32.totalorder %s45_s21, %s45_s21 }
  0x2c   :  { %p509_p5 = scmp.ne.s32.totalorder %s45_s21, %s508_s29  ;;  %p514_p7 = scmp.lt.s32.totalorder %s508_s29, %s508_s29 }
  0x2e   :  { %p515_p8 = por %p514_p7, %p513_p6 }
  0x30   :  { %p516_p9 = pnand %p515_p8, %p509_p5 }
  0x32   :  { %519 = shalt.err (!%p516_p9)
}
  0x33   :  { %50 = dma.hbm_to_vmem [thread:$0]  %s655_s3, 4096, %s45_s21, [#allocation7], %s552_s1, %s552_s1, %s553_s17  }
  0x34   :  { %542 = dma.done.wait [#allocation4], 256  }
  0x35   :  { %543 = vsyncadd [#allocation4], 4294967040 }
  0x36   :  { %544 = dma.done.wait [#allocation7], 8192  }
  0x37   :  { %545 = vsyncadd [#allocation7], 4294959104  ;;  %v555_v0 = vmov 0.0   ;;  %v73_v1 = vld [vmem:[#allocation6 + $0x8] sm:$0xff]  ;;  %v75_v2 = vld [vmem:[#allocation6 + $0x18] sm:$0xff]  ;;  %s556_s8 = smov [#allocation9]  }
  0x38   :  { %212 = vmatprep.mubr.f32.mxu0 %v555_v0  ;;  %v72_v3 = vld [vmem:[#allocation6] sm:$0xff]  ;;  %v381_v4 = vpack.c.bf16 %v75_v2, %v73_v1  ;;  %v74_v5 = vld [vmem:[#allocation6 + $0x10] sm:$0xff]  ;;  %v77_v6 = vld [vmem:[#allocation6 + $0x28] sm:$0xff]  ;;  %s329_s9 = sshll.u32 %s556_s8, 4  ;;  %s330_s9 = int_to_ptr.vmem [resolvable:$true] %s329_s9 }
  0x39   :  { %v79_v7 = vld [vmem:[#allocation6 + $0x38] sm:$0xff]  ;;  %v383_v8 = vpack.c.bf16 %v74_v5, %v72_v3  ;;  %v76_v10 = vld [vmem:[#allocation6 + $0x20] sm:$0xff]  ;;  %v78_v11 = vld [vmem:[#allocation6 + $0x30] sm:$0xff]  ;;  %s520_s10 = scalar_lea.vmem %s330_s9, 256  ;;  %p525_p11 = scmp.lt.s32.totalorder %s330_s9, %s330_s9 }
  0x3a   :  { %v385_v9 = vpack.c.bf16 %v79_v7, %v77_v6  ;;  %v81_v12 = vld [vmem:[#allocation6 + $0x48] sm:$0xff]  ;;  %382 = vmatprep.subr.bf16.mxu0 %v381_v4  ;;  %v83_v13 = vld [vmem:[#allocation6 + $0x58] sm:$0xff]  ;;  %v387_v14 = vpack.c.bf16 %v78_v11, %v76_v10  ;;  %v80_v16 = vld [vmem:[#allocation6 + $0x40] sm:$0xff]  ;;  %p521_p10 = scmp.ne.s32.totalorder %s330_s9, %s520_s10  ;;  %p526_p12 = scmp.lt.s32.totalorder %s520_s10, %s520_s10 }
  0x3b   :  { %384 = vmatpush1.bf16.msra.mxu0 %v383_v8  ;;  %v389_v15 = vpack.c.bf16 %v83_v13, %v81_v12  ;;  %v82_v17 = vld [vmem:[#allocation6 + $0x50] sm:$0xff]  ;;  %v85_v18 = vld [vmem:[#allocation6 + $0x68] sm:$0xff]  ;;  %v87_v19 = vld [vmem:[#allocation6 + $0x78] sm:$0xff] }
  0x3c   :  { %386 = vmatprep.subr.bf16.mxu0 %v385_v9  ;;  %v391_v20 = vpack.c.bf16 %v82_v17, %v80_v16  ;;  %v393_v21 = vpack.c.bf16 %v87_v19, %v85_v18  ;;  %v84_v22 = vld [vmem:[#allocation6 + $0x60] sm:$0xff]  ;;  %v86_v23 = vld [vmem:[#allocation6 + $0x70] sm:$0xff]  ;;  %v89_v24 = vld [vmem:[#allocation6 + $0x88] sm:$0xff]  ;;  %p527_p13 = por %p526_p12, %p525_p11 }
  0x3d   :  { %v91_v25 = vld [vmem:[#allocation6 + $0x98] sm:$0xff]  ;;  %v88_v26 = vld [vmem:[#allocation6 + $0x80] sm:$0xff]  ;;  %v90_v27 = vld [vmem:[#allocation6 + $0x90] sm:$0xff]  ;;  %v395_v30 = vpack.c.bf16 %v86_v23, %v84_v22 }
  0x3e   :  { %v121_v28 = vld [vmem:[#allocation8 + $0x80] sm:$0xff]  ;;  %v122_v29 = vld [vmem:[#allocation8 + $0x88] sm:$0xff]  ;;  %v123_v35 = vld [vmem:[#allocation8 + $0x90] sm:$0xff]  ;;  %v397_v36 = vpack.c.bf16 %v91_v25, %v89_v24  ;;  %v399_v46 = vpack.c.bf16 %v90_v27, %v88_v26  ;;  %p528_p0 = pnand %p527_p13, %p521_p10 }
  0x3f   :  { %388 = vmatpush1.bf16.msra.mxu0 %v387_v14  ;;  %v93_v31 = vld [vmem:[#allocation6 + $0xa8] sm:$0xff]  ;;  %v413_v32 = vpack.c.bf16 %v122_v29, %v121_v28  ;;  %v105_v33 = vld [vmem:[#allocation8] sm:$0xff]  ;;  %v124_v38 = vld [vmem:[#allocation8 + $0x98] sm:$0xff] }
  0x40   :  { %390 = vmatprep.subr.bf16.mxu0 %v389_v15  ;;  %v106_v34 = vld [vmem:[#allocation8 + $0x8] sm:$0xff]  ;;  %v107_v39 = vld [vmem:[#allocation8 + $0x10] sm:$0xff]  ;;  %v108_v40 = vld [vmem:[#allocation8 + $0x18] sm:$0xff]  ;;  %v417_v42 = vpack.c.bf16 %v124_v38, %v123_v35 }
  0x41   :  { %v415_v37 = vpack.c.bf16 %v106_v34, %v105_v33  ;;  %v95_v41 = vld [vmem:[#allocation6 + $0xb8] sm:$0xff]  ;;  %414 = vmatprep.subr.bf16.mxu1 %v413_v32  ;;  %v125_v43 = vld [vmem:[#allocation8 + $0xa0] sm:$0xff]  ;;  %v126_v44 = vld [vmem:[#allocation8 + $0xa8] sm:$0xff]  ;;  %v419_v45 = vpack.c.bf16 %v108_v40, %v107_v39 }
  0x42   :  { %v92_v47 = vld [vmem:[#allocation6 + $0xa0] sm:$0xff]  ;;  %v421_v48 = vpack.c.bf16 %v126_v44, %v125_v43  ;;  %v110_v50 = vld [vmem:[#allocation8 + $0x28] sm:$0xff]  ;;  %v401_v51 = vpack.c.bf16 %v95_v41, %v93_v31  ;;  %v94_v52 = vld [vmem:[#allocation6 + $0xb0] sm:$0xff] }
  0x43   :  { %392 = vmatpush1.bf16.msra.mxu0 %v391_v20  ;;  %416 = vmatpush3.bf16.msra.mxu1 %v415_v37  ;;  %v109_v49 = vld [vmem:[#allocation8 + $0x20] sm:$0xff]  ;;  %v127_v53 = vld [vmem:[#allocation8 + $0xb0] sm:$0xff]  ;;  %v128_v54 = vld [vmem:[#allocation8 + $0xb8] sm:$0xff]  ;;  %v403_v58 = vpack.c.bf16 %v94_v52, %v92_v47 }
  0x44   :  { %394 = vmatprep.subr.bf16.mxu0 %v393_v21  ;;  %418 = vmatprep.subr.bf16.mxu1 %v417_v42  ;;  %v97_v55 = vld [vmem:[#allocation6 + $0xc8] sm:$0xff]  ;;  %v99_v56 = vld [vmem:[#allocation6 + $0xd8] sm:$0xff]  ;;  %v423_v57 = vpack.c.bf16 %v110_v50, %v109_v49  ;;  %v96_v59 = vld [vmem:[#allocation6 + $0xc0] sm:$0xff]  ;;  %v425_v60 = vpack.c.bf16 %v128_v54, %v127_v53 }
  0x45   :  { %v111_v61 = vld [vmem:[#allocation8 + $0x30] sm:$0xff]  ;;  %v112_v62 = vld [vmem:[#allocation8 + $0x38] sm:$0xff]  ;;  %v405_v63 = vpack.c.bf16 %v99_v56, %v97_v55  ;;  %v129_v2 = vld [vmem:[#allocation8 + $0xc0] sm:$0xff] }
  0x46   :  { %v98_v1 = vld [vmem:[#allocation6 + $0xd0] sm:$0xff]  ;;  %v130_v3 = vld [vmem:[#allocation8 + $0xc8] sm:$0xff]  ;;  %v103_v5 = vld [vmem:[#allocation6 + $0xf8] sm:$0xff]  ;;  %v427_v6 = vpack.c.bf16 %v112_v62, %v111_v61 }
  0x47   :  { %396 = vmatpush1.bf16.msra.mxu0 %v395_v30  ;;  %420 = vmatpush3.bf16.msra.mxu1 %v419_v45  ;;  %v101_v4 = vld [vmem:[#allocation6 + $0xe8] sm:$0xff]  ;;  %v407_v7 = vpack.c.bf16 %v98_v1, %v96_v59  ;;  %v100_v8 = vld [vmem:[#allocation6 + $0xe0] sm:$0xff]  ;;  %v429_v9 = vpack.c.bf16 %v130_v3, %v129_v2  ;;  %v102_v13 = vld [vmem:[#allocation6 + $0xf0] sm:$0xff] }
  0x48   :  { %398 = vmatprep.subr.bf16.mxu0 %v397_v36  ;;  %422 = vmatprep.subr.bf16.mxu1 %v421_v48  ;;  %v113_v10 = vld [vmem:[#allocation8 + $0x40] sm:$0xff]  ;;  %v114_v11 = vld [vmem:[#allocation8 + $0x48] sm:$0xff]  ;;  %v409_v12 = vpack.c.bf16 %v103_v5, %v101_v4  ;;  %v131_v14 = vld [vmem:[#allocation8 + $0xd0] sm:$0xff]  ;;  %v411_v17 = vpack.c.bf16 %v102_v13, %v100_v8  ;;  %v138_v36 = vlaneseq }
  0x49   :  { %v132_v15 = vld [vmem:[#allocation8 + $0xd8] sm:$0xff]  ;;  %v431_v16 = vpack.c.bf16 %v114_v11, %v113_v10  ;;  %v115_v19 = vld [vmem:[#allocation8 + $0x50] sm:$0xff]  ;;  %v133_v21 = vld [vmem:[#allocation8 + $0xe0] sm:$0xff] }
  0x4a   :  { %v433_v18 = vpack.c.bf16 %v132_v15, %v131_v14  ;;  %v116_v20 = vld [vmem:[#allocation8 + $0x58] sm:$0xff]  ;;  %v134_v22 = vld [vmem:[#allocation8 + $0xe8] sm:$0xff]  ;;  %v68_v24 = vld [vmem:[#allocation3] sm:$0xff]  ;;  %v139_v37 = vshrl.u32 %v138_v36, 7 }
  0x4b   :  { %400 = vmatpush1.bf16.msra.mxu0 %v399_v46  ;;  %424 = vmatpush3.bf16.msra.mxu1 %v423_v57  ;;  %v435_v23 = vpack.c.bf16 %v116_v20, %v115_v19  ;;  %v437_v25 = vpack.c.bf16 %v134_v22, %v133_v21  ;;  %v69_v26 = vld [vmem:[#allocation3 + $0x8] sm:$0xff]  ;;  %v117_v27 = vld [vmem:[#allocation8 + $0x60] sm:$0xff]  ;;  %v118_v28 = vld [vmem:[#allocation8 + $0x68] sm:$0xff] }
  0x4c   :  { %402 = vmatprep.subr.bf16.mxu0 %v401_v51  ;;  %426 = vmatprep.subr.bf16.mxu1 %v425_v60  ;;  %v439_v29 = vpack.c.bf16 %v118_v28, %v117_v27  ;;  %v135_v30 = vld [vmem:[#allocation8 + $0xf0] sm:$0xff]  ;;  %v136_v31 = vld [vmem:[#allocation8 + $0xf8] sm:$0xff]  ;;  %v140_v38 = vsub.s32 0, %v139_v37  ;;  %v144_v39 = vsub.s32 1, %v139_v37 }
  0x4d   :  { %v441_v32 = vpack.c.bf16 %v136_v31, %v135_v30  ;;  %v119_v33 = vld [vmem:[#allocation8 + $0x70] sm:$0xff]  ;;  %v120_v34 = vld [vmem:[#allocation8 + $0x78] sm:$0xff] }
  0x4e   :  { %v443_v35 = vpack.c.bf16 %v120_v34, %v119_v33  ;;  %v342_v56 = vld [vmem:[%s656_s4] ss:$0 sm:$0xff] }
  0x4f   :  { %404 = vmatpush1.bf16.msra.mxu0 %v403_v58  ;;  %428 = vmatpush3.bf16.msra.mxu1 %v427_v6 }
  0x50   :  { %406 = vmatprep.subr.bf16.mxu0 %v405_v63  ;;  %430 = vmatprep.subr.bf16.mxu1 %v429_v9 }
  0x53   :  { %408 = vmatpush1.bf16.msra.mxu0 %v407_v7  ;;  %432 = vmatpush3.bf16.msra.mxu1 %v431_v16 }
  0x54   :  { %410 = vmatprep.subr.bf16.mxu0 %v409_v12  ;;  %434 = vmatprep.subr.bf16.mxu1 %v433_v18 }
  0x57   :  { %412 = vmatpush1.bf16.msra.mxu0 %v411_v17  ;;  %436 = vmatpush3.bf16.msra.mxu1 %v435_v23 }
  0x58   :  { %438 = vmatprep.subr.bf16.mxu1 %v437_v25 }
  0x5a   :  { %213 = vmatmul.mubr.f32.vlgmr.msra.gmra.mrb[0].mxu0 %v68_v24 }
  0x5b   :  { %218 = vmatprep.mubr.f32.mxu0 %v555_v0  ;;  %440 = vmatpush3.bf16.msra.mxu1 %v439_v29  ;;  %v104_v0 = vld [vmem:[%s654_s2] sm:$0x3] }
  0x5c   :  { %442 = vmatprep.subr.bf16.mxu1 %v441_v32  ;;  %v141_v40 = vrot.slane %v104_v0, %v140_v38  ;;  %v145_v41 = vrot.slane %v104_v0, %v144_v39 }
  0x5e   :  { %219 = vmatmul.mubr.f32.gmra.mrb[2].mxu0 %v69_v26 }
  0x5f   :  { %444 = vmatpush3.bf16.msra.mxu1 %v443_v35 }
 0x12d   :  { %v214_v42 = vpop.f32.mrb[0].mxu0 }
 0x12e   :  { %v215_v43 = vadd.f32 %v214_v42, %v141_v40  ;;  %v216_v44 = vpop.f32.mrb[1].mxu0 }
 0x12f   :  { %v217_v45 = vadd.f32 %v216_v44, %v145_v41 }
 0x130   :  { %v225_v48 = vmax.f32 %v215_v43, 0.0 }
 0x131   :  { %v220_v46 = vpop.f32.mrb[2].mxu0  ;;  %v226_v47 = vmax.f32 %v217_v45, 0.0 }
 0x132   :  { %v221_v49 = vadd.f32 %v220_v46, %v141_v40  ;;  %v222_v50 = vpop.f32.mrb[3].mxu0 }
 0x133   :  { %v223_v51 = vadd.f32 %v222_v50, %v145_v41  ;;  %293 = vmatprep.mubr.f32.mxu1 %v226_v47 }
 0x134   :  { %294 = vmatmul.mubr.f32.vlgmr.msra.gmra.mrb[0].mxu1 %v225_v48  ;;  %v227_v53 = vmax.f32 %v221_v49, 0.0 }
 0x135   :  { %v228_v52 = vmax.f32 %v223_v51, 0.0 }
 0x137   :  { %298 = vmatprep.mubr.f32.mxu1 %v228_v52 }
 0x138   :  { %299 = vmatmul.mubr.f32.gmra.mrb[2].mxu1 %v227_v53 }
 0x207   :  { %v375_v54 = vpop.f32.mrb[0].mxu1 }
 0x208   :  { %v376_v55 = vpop.f32.mrb[1].mxu1 }
 0x209   :  { %v377_v57 = vadd.f32 %v376_v55, %v375_v54 }
 0x20b   :  { %v320_v58 = vadd.f32 %v377_v57, %v342_v56  ;;  %v378_v59 = vpop.f32.mrb[2].mxu1 }
 0x20c   :  { %v379_v60 = vpop.f32.mrb[3].mxu1 }
 0x20d   :  { %322 = vst [vmem:[#allocation9] sm:$0xff] %v320_v58  ;;  %v380_v61 = vadd.f32 %v379_v60, %v378_v59 }
 0x20f   :  { %v321_v62 = vadd.f32 %v380_v61, %v342_v56 }
 0x211   :  { %323 = vst [vmem:[#allocation9 + $0x8] sm:$0xff] %v321_v62 }
 0x212   :  { %531 = shalt.err (!%p528_p0)
}
 0x213   :  { %s532_s12 = scalar_lea.hbm %s657_s5, 256 }
 0x214   :  { %p533_p1 = scmp.ne.s32.totalorder %s657_s5, %s532_s12  ;;  %p536_p2 = scmp.lt.u32.totalorder %s532_s12, %s657_s5 }
 0x216   :  { %p538_p3 = pnand %p536_p2, %p533_p1 }
 0x218   :  { %541 = shalt.err (!%p538_p3)
}
 0x219   :  { %335 = dma.vmem_to_hbm [thread:$0]  %s330_s9, 256, %s657_s5, [#allocation5], %s552_s1, %s552_s1, %s553_s17  }
 0x21a   :  { %546 = dma.done.wait [#allocation5], 256  }
 0x21b   :  { %547 = vsyncadd [#allocation5], 4294967040 }
 0x21c   :  { %339 = vsyncpa [#allocation4], 1 }
 0x21d   :  { %340 = vsyncpa [#allocation7], 1 }
 0x21e   :  { %341 = vsyncpa [#allocation5], 1 }

</bundles_post_ra>
